<compile_context>
chip_gen: v6e
topology: v6e:2x2x1
jax: 0.10.0
libtpu: 0.0.40
codegen_flags: <defaults>
</compile_context>

<pallas_src>
import functools

import jax
import jax.numpy as jnp
from jax.experimental import pallas as pl
from jax.experimental.pallas import tpu as pltpu


def _cdiv(a: int, b: int) -> int:
    return -(-a // b)


def _round_up(x: int, m: int) -> int:
    return _cdiv(x, m) * m


def _vmem_capacity_bytes() -> int:
    try:
        cap = getattr(pltpu.get_tpu_info(), "vmem_capacity_bytes", None)
        if cap:
            return int(cap)
    except Exception:
        pass
    return 64 * 1024 * 1024  # conservative fallback: v7x physical VMEM / core


def _respool_kernel(mask_ref, emb_ref, out_ref, acc_ref, cnt_ref, *,
                    true_l: int, tl: int):
    """Grid = (batch tiles, D tiles, residue tiles); residues are the reduction.

    mask_ref: (tb, tl)       lane-dense 0/1 mask tile (embedding dtype)
    emb_ref:  (tb, tl, td)   embedding tile (native dtype, no upcast in HBM)
    out_ref:  (tb, td)       written once, at the last residue step
    acc_ref:  (tb, td) f32   masked-sum accumulator (VMEM scratch)
    cnt_ref:  (tb, 1)  f32   valid-residue-count accumulator (VMEM scratch)
    """
    li = pl.program_id(2)

    @pl.when(li == 0)
    def _init():
        acc_ref[...] = jnp.zeros_like(acc_ref)
        cnt_ref[...] = jnp.zeros_like(cnt_ref)

    m = mask_ref[...]
    e = emb_ref[...]

    if true_l % tl != 0:
        # Inputs are NOT padded in HBM: the ragged tail of the residue axis in
        # the last residue block is undefined (possibly NaN/Inf).  Scrub both
        # the mask and the embedding columns before they reach the
        # accumulators (relying on mask*garbage == 0 is unsafe: 0*NaN = NaN).
        rem = true_l - li * tl
        col = jax.lax.broadcasted_iota(jnp.int32, m.shape, dimension=1)
        valid = col < rem
        m = jnp.where(valid, m, jnp.zeros_like(m))
        valid3 = jnp.broadcast_to(valid[:, :, None], e.shape)
        e = jnp.where(valid3, e, jnp.zeros_like(e))

    # One fused batched contraction (flash-attention-style batched matmul with
    # M = 1 per batch row): (tb,1,tl) @ (tb,tl,td) -> (tb,1,td), accumulated
    # in f32.  HIGHEST precision avoids the default bf16 downcast of f32
    # inputs on the MXU; the kernel is HBM-bound so the extra passes are free.
    acc_ref[...] += jnp.einsum(
        "bql,bld->bqd", m[:, None, :], e,
        precision=jax.lax.Precision.HIGHEST,
        preferred_element_type=jnp.float32)[:, 0, :]
    cnt_ref[...] += jnp.sum(m.astype(jnp.float32), axis=1, keepdims=True)

    @pl.when(li == pl.num_programs(2) - 1)
    def _finalize():
        # Exact division: runs once per (batch, D) tile, entirely off the DMA
        # critical path, so it is free and keeps full f32 accuracy.
        denom = jnp.maximum(cnt_ref[...], 1e-8)
        out_ref[...] = (acc_ref[...] / denom).astype(out_ref.dtype)


def _choose_tiles(B, L, D, itemsize, block_b, block_l, block_d, vmem_cap):
    # Batch tile: second-minor dim of the mask/out blocks -> must be a
    # multiple of 8 or equal to the full batch dim.
    if block_b is not None:
        tb = int(block_b)
        if tb != B and tb % 8 != 0:
            raise ValueError("block_b must be a multiple of 8 or equal to B")
    else:
        tb = B if B <= 8 else 8

    # ~12-16 MiB per embedding input buffer (BlockSpec double-buffers it):
    # large enough to amortize the ~0.35us/grid-step overhead to <5% on all
    # generations, small enough to fit v7x's 64 MiB physical VMEM.
    emb_budget = min(16 << 20, max(2 << 20, int(vmem_cap * 0.18)))

    # D tile (minor dim of emb/out blocks): multiple of 128 or full D.
    if block_d is not None:
        td = int(block_d)
        if td != D and td % 128 != 0:
            raise ValueError("block_d must be a multiple of 128 or equal to D")
    else:
        td = D
        min_tl = L if L <= 128 else 128
        if D > 128 and tb * min_tl * D * itemsize > emb_budget:
            # Wide-D configs: split D so even a minimal residue slab fits the
            # budget (prevents VMEM OOM, keeps double-buffering).
            nd = _cdiv(tb * min_tl * D * itemsize, emb_budget)
            td = max(128, _round_up(_cdiv(D, nd), 128))
        if (td == D and B <= tb and D >= 256
                and B * L * D * itemsize >= (8 << 20)):
            # Megacore (v7x): with a single batch tile, split D so the second
            # TensorCore gets "parallel" work; near-free on 1-TC chips.
            td = _round_up(_cdiv(D, 2), 128)

    # Residue (reduction) tile: multiple of 128 or full L; balanced so the
    # ragged tail of the last block stays small.
    if block_l is not None:
        tl = int(block_l)
        if tl != L and tl % 128 != 0:
            raise ValueError("block_l must be a multiple of 128 or equal to L")
    else:
        max_tl = max(128, (emb_budget // max(1, tb * td * itemsize)) // 128 * 128)
        if L <= max_tl:
            tl = L  # single residue block: full-dim, always legal
        else:
            tl = _round_up(_cdiv(L, _cdiv(L, max_tl)), 128)

    return tb, td, tl


@functools.partial(jax.jit, static_argnames=("block_b", "block_l", "block_d"))
def res_pool(res_embedding: jax.Array, mask: jax.Array,
             *, block_b=None, block_l=None, block_d=None) -> jax.Array:
    """Masked mean pooling over the residue axis.

    Args:
      res_embedding: (B, L, D) float array (f32 or bf16).
      mask:          (B, L) float/bool array (1 = valid residue).
    Returns:
      (B, D) pooled embedding in res_embedding's dtype.
    """
    B, L, D = res_embedding.shape
    dtype = res_embedding.dtype
    itemsize = jnp.dtype(dtype).itemsize
    # 0/1 mask in the embedding dtype (exact in bf16/f32); stays lane-dense
    # (B, L).  No host-side padding of either input: ragged edges are handled
    # inside the kernel, so the big (B, L, D) tensor is read exactly once.
    mask = mask.astype(dtype)

    vmem_cap = _vmem_capacity_bytes()
    tb, td, tl = _choose_tiles(B, L, D, itemsize,
                               block_b, block_l, block_d, vmem_cap)
    num_b, num_d, num_l = _cdiv(B, tb), _cdiv(D, td), _cdiv(L, tl)

    # Scoped VMEM limit derived from the actual (double-buffered) working set,
    # clamped to 90% of physical VMEM (v7x-safe).
    emb_buf = tb * tl * td * itemsize
    mask_buf = tb * tl * itemsize
    out_buf = tb * td * itemsize
    acc_bytes = tb * td * 4 + tb * 128 * 4
    working = 2 * emb_buf + 2 * mask_buf + 2 * out_buf + acc_bytes
    vmem_limit = int(min(vmem_cap * 0.9,
                         max(32 << 20, working * 3 // 2 + (2 << 20))))

    kernel = functools.partial(_respool_kernel, true_l=L, tl=tl)

    out = pl.pallas_call(
        kernel,
        out_shape=jax.ShapeDtypeStruct((B, D), dtype),
        grid_spec=pltpu.PrefetchScalarGridSpec(
            num_scalar_prefetch=0,
            grid=(num_b, num_d, num_l),
            in_specs=[
                pl.BlockSpec((tb, tl), lambda bi, di, li: (bi, li)),          # mask
                pl.BlockSpec((tb, tl, td), lambda bi, di, li: (bi, li, di)),  # emb
            ],
            out_specs=pl.BlockSpec((tb, td), lambda bi, di, li: (bi, di)),
            scratch_shapes=[
                pltpu.VMEM((tb, td), jnp.float32),   # masked-sum accumulator
                pltpu.VMEM((tb, 1), jnp.float32),    # valid-count accumulator
            ],
        ),
        compiler_params=pltpu.CompilerParams(
            dimension_semantics=("parallel", "parallel", "arbitrary"),
            vmem_limit_bytes=vmem_limit,
        ),
        cost_estimate=pl.CostEstimate(
            flops=2 * B * L * D,
            transcendentals=0,
            bytes_accessed=(B * L * D * itemsize
                            + num_d * B * L * itemsize
                            + B * D * itemsize),
        ),
    )(mask, res_embedding)
    return out


if __name__ == "__main__":
    key = jax.random.PRNGKey(0)
    k1, k2, k3, k4, k5, k6 = jax.random.split(key, 6)

    def reference(emb, m):
        m = m.astype(jnp.float32)
        e = emb.astype(jnp.float32)
        s = jnp.sum(e * m[..., None], axis=1)
        c = jnp.maximum(jnp.sum(m, axis=1, keepdims=True), 1e-8)
        return s / c

    # 1) Small canonical shape: single tile on every axis.
    B, L, D = 2, 8, 32
    emb = jax.random.normal(k1, (B, L, D), dtype=jnp.float32)
    m = (jax.random.uniform(k2, (B, L)) > 0.3).astype(jnp.float32)
    m = m.at[:, 0].set(1.0)   # at least one valid residue per sequence
    out = jax.block_until_ready(res_pool(emb, m))
    assert out.shape == (B, D)
    assert jnp.allclose(out, reference(emb, m), atol=1e-4, rtol=1e-4)

    # 2) Ragged shape: batch-edge and residue-edge scrub + multi-step
    #    accumulation (grid = (2, 1, 2)), no host-side padding anywhere.
    B2, L2, D2 = 13, 250, 128
    emb2 = jax.random.normal(k3, (B2, L2, D2), dtype=jnp.float32)
    m2 = (jax.random.uniform(k4, (B2, L2)) > 0.3).astype(jnp.float32)
    m2 = m2.at[:, 0].set(1.0)
    out2 = jax.block_until_ready(res_pool(emb2, m2, block_b=8, block_l=128))
    assert out2.shape == (B2, D2)
    assert jnp.allclose(out2, reference(emb2, m2), atol=1e-4, rtol=1e-4)

    # 3) bf16 embeddings consumed directly + a tiled D axis (grid = (1, 2, 1)).
    B3, L3, D3 = 4, 64, 256
    emb3 = jax.random.normal(k5, (B3, L3, D3), dtype=jnp.float32).astype(jnp.bfloat16)
    m3 = (jax.random.uniform(k6, (B3, L3)) > 0.3).astype(jnp.float32)
    m3 = m3.at[:, 0].set(1.0)
    out3 = jax.block_until_ready(res_pool(emb3, m3, block_d=128))
    assert out3.shape == (B3, D3)
    assert jnp.allclose(out3.astype(jnp.float32), reference(emb3, m3),
                        atol=2e-2, rtol=2e-2)

    print("KERNEL_OK")
</pallas_src>

<mosaic_0001>
module attributes {stable_mosaic.version = 11 : i64} {
  func.func @_respool_kernel(%arg0: i32, %arg1: i32, %arg2: i32, %arg3: memref<2x8xf32, #tpu.memory_space<vmem>>, %arg4: memref<2x8x32xf32, #tpu.memory_space<vmem>>, %arg5: memref<2x32xf32, #tpu.memory_space<vmem>>, %arg6: memref<2x32xf32, #tpu.memory_space<vmem>>, %arg7: memref<2x1xf32, #tpu.memory_space<vmem>>) attributes {dimension_semantics = [#tpu.dimension_semantics<parallel>, #tpu.dimension_semantics<parallel>, #tpu.dimension_semantics<arbitrary>], iteration_bounds = array<i64: 1, 1, 1>, scalar_prefetch = 0 : i64, scratch_operands = 2 : i64, tpu.core_type = #tpu.core_type<tc>, window_params = [{transform_indices = @transform_0, window_bounds = array<i64: 2, 8>}, {transform_indices = @transform_1, window_bounds = array<i64: 2, 8, 32>}, {transform_indices = @transform_2, window_bounds = array<i64: 2, 32>}]} {
    %c0_i32 = arith.constant 0 : i32
    %0 = arith.cmpi eq, %arg2, %c0_i32 : i32
    %1 = arith.extui %0 : i1 to i32
    %c0_i32_0 = arith.constant 0 : i32
    %2 = arith.cmpi ne, %1, %c0_i32_0 : i32
    scf.if %2 {
      %cst_16 = arith.constant 0.000000e+00 : f32
      %19 = vector.broadcast %cst_16 : f32 to vector<2x32xf32>
      %c0_17 = arith.constant 0 : index
      %c0_18 = arith.constant 0 : index
      %20 = vector.load %arg6[%c0_17, %c0_18] : memref<2x32xf32, #tpu.memory_space<vmem>>, vector<2x32xf32>
      tpu.vector_store %arg6[%c0_17, %c0_18], %19 {strides = array<i32>} : memref<2x32xf32, #tpu.memory_space<vmem>>, vector<2x32xf32>,
      %cst_19 = arith.constant 0.000000e+00 : f32
      %21 = vector.broadcast %cst_19 : f32 to vector<2x1xf32>
      %c0_20 = arith.constant 0 : index
      %c0_21 = arith.constant 0 : index
      %22 = vector.load %arg7[%c0_20, %c0_21] : memref<2x1xf32, #tpu.memory_space<vmem>>, vector<2x1xf32>
      tpu.vector_store %arg7[%c0_20, %c0_21], %21 {strides = array<i32>} : memref<2x1xf32, #tpu.memory_space<vmem>>, vector<2x1xf32>,
    } else {
    }
    %c0 = arith.constant 0 : index
    %c0_1 = arith.constant 0 : index
    %3 = vector.load %arg3[%c0, %c0_1] : memref<2x8xf32, #tpu.memory_space<vmem>>, vector<2x8xf32>
    %c0_2 = arith.constant 0 : index
    %c0_3 = arith.constant 0 : index
    %c0_4 = arith.constant 0 : index
    %4 = vector.load %arg4[%c0_2, %c0_3, %c0_4] : memref<2x8x32xf32, #tpu.memory_space<vmem>>, vector<2x8x32xf32>
    %c0_5 = arith.constant 0 : index
    %c0_6 = arith.constant 0 : index
    %5 = vector.load %arg6[%c0_5, %c0_6] : memref<2x32xf32, #tpu.memory_space<vmem>>, vector<2x32xf32>
    %6 = vector.shape_cast %3 : vector<2x8xf32> to vector<2x1x8xf32>
    "tpu.trace_start"() <{level = 10 : i32, message = "bql,bld->bqd"}> : () -> ()
    %cst = arith.constant dense<0.000000e+00> : vector<2x1x32xf32>
    %7 = tpu.matmul %6, %4, %cst {dimension_numbers = #tpu.dot_dimension_numbers<[2], [1], [1], [2], [0, 0, 0, 1, 1, 2], [0], [0]>, precision = #tpu.contract_precision<fp32>} : vector<2x1x8xf32>, vector<2x8x32xf32>, vector<2x1x32xf32> -> vector<2x1x32xf32>
    "tpu.trace_stop"() : () -> ()
    %8 = vector.shape_cast %7 : vector<2x1x32xf32> to vector<2x32xf32>
    %9 = arith.addf %5, %8 : vector<2x32xf32>
    %c0_7 = arith.constant 0 : index
    %c0_8 = arith.constant 0 : index
    %10 = vector.load %arg6[%c0_7, %c0_8] : memref<2x32xf32, #tpu.memory_space<vmem>>, vector<2x32xf32>
    tpu.vector_store %arg6[%c0_7, %c0_8], %9 {strides = array<i32>} : memref<2x32xf32, #tpu.memory_space<vmem>>, vector<2x32xf32>,
    %c0_9 = arith.constant 0 : index
    %c0_10 = arith.constant 0 : index
    %11 = vector.load %arg7[%c0_9, %c0_10] : memref<2x1xf32, #tpu.memory_space<vmem>>, vector<2x1xf32>
    %cst_11 = arith.constant dense<0.000000e+00> : vector<2xf32>
    %12 = vector.multi_reduction <add>, %3, %cst_11 [1] : vector<2x8xf32> to vector<2xf32>
    %13 = vector.shape_cast %12 : vector<2xf32> to vector<2x1xf32>
    %14 = arith.addf %11, %13 : vector<2x1xf32>
    %c0_12 = arith.constant 0 : index
    %c0_13 = arith.constant 0 : index
    %15 = vector.load %arg7[%c0_12, %c0_13] : memref<2x1xf32, #tpu.memory_space<vmem>>, vector<2x1xf32>
    tpu.vector_store %arg7[%c0_12, %c0_13], %14 {strides = array<i32>} : memref<2x1xf32, #tpu.memory_space<vmem>>, vector<2x1xf32>,
    %c0_i32_14 = arith.constant 0 : i32
    %16 = arith.cmpi eq, %arg2, %c0_i32_14 : i32
    %17 = arith.extui %16 : i1 to i32
    %c0_i32_15 = arith.constant 0 : i32
    %18 = arith.cmpi ne, %17, %c0_i32_15 : i32
    scf.if %18 {
      %c0_16 = arith.constant 0 : index
      %c0_17 = arith.constant 0 : index
      %19 = vector.load %arg7[%c0_16, %c0_17] : memref<2x1xf32, #tpu.memory_space<vmem>>, vector<2x1xf32>
      %cst_18 = arith.constant 9.99999993E-9 : f32
      %20 = vector.broadcast %cst_18 : f32 to vector<2x1xf32>
      %21 = arith.maximumf %19, %20 : vector<2x1xf32>
      %c0_19 = arith.constant 0 : index
      %c0_20 = arith.constant 0 : index
      %22 = vector.load %arg6[%c0_19, %c0_20] : memref<2x32xf32, #tpu.memory_space<vmem>>, vector<2x32xf32>
      %23 = vector.broadcast %21 : vector<2x1xf32> to vector<2x32xf32>
      %24 = arith.divf %22, %23 : vector<2x32xf32>
      %c0_21 = arith.constant 0 : index
      %c0_22 = arith.constant 0 : index
      %25 = vector.load %arg5[%c0_21, %c0_22] : memref<2x32xf32, #tpu.memory_space<vmem>>, vector<2x32xf32>
      tpu.vector_store %arg5[%c0_21, %c0_22], %24 {strides = array<i32>} : memref<2x32xf32, #tpu.memory_space<vmem>>, vector<2x32xf32>,
    } else {
    }
    return
  }
  func.func @transform_0(%arg0: i32, %arg1: i32, %arg2: i32) -> (i32, i32) {
    %c0_i32 = arith.constant 0 : i32
    return %arg0, %arg2 : i32, i32
  }
  func.func @transform_1(%arg0: i32, %arg1: i32, %arg2: i32) -> (i32, i32, i32) {
    %c0_i32 = arith.constant 0 : i32
    return %arg0, %arg2, %arg1 : i32, i32, i32
  }
  func.func @transform_2(%arg0: i32, %arg1: i32, %arg2: i32) -> (i32, i32) {
    %c0_i32 = arith.constant 0 : i32
    return %arg0, %arg1 : i32, i32
  }
}

</mosaic_0001>

<bundles_post_ra>
// kernel: res_pool.1
= control target key start
LH: loop header
LB: loop body
LE: loop exit
PB: predicated region body
PF: predicated region fallthrough
CT: control target
= control target key end

     0   :  { %7 = vsyncpa [#allocation5], 0  ;;  %s1255_s0 = inlined_call_operand.hbm [shape: f32[2,8], index: 0, kind: input, shape index: {}]   ;;  %s1256_s1 = inlined_call_operand.hbm [shape: f32[2,8,32], index: 1, kind: input, shape index: {}]   ;;  %s1257_s2 = inlined_call_operand.hbm [shape: f32[2,32], index: 2, kind: output, shape index: {}]  }
   0x1   :  { %8 = vsyncpa [#allocation8], 0 }
   0x2   :  { %9 = vsyncpa [#allocation6], 0  ;;  %s1179_s9 = smov [#allocation4]   ;;  %s1180_s11 = smov [#allocation7]  }
   0x3   :  { %s16_s10 = sshll.u32 %s1179_s9, 4  ;;  %s25_s12 = sshll.u32 %s1180_s11, 4  ;;  %s17_s10 = int_to_ptr.vmem [resolvable:$true] %s16_s10  ;;  %s26_s12 = int_to_ptr.vmem [resolvable:$true] %s25_s12 }
   0x4   :  { %s1121_s13 = scalar_lea.vmem %s17_s10, 32  ;;  %p1126_p1 = scmp.lt.s32.totalorder %s17_s10, %s17_s10 }
   0x5   :  { %p1122_p0 = scmp.ne.s32.totalorder %s17_s10, %s1121_s13  ;;  %p1127_p2 = scmp.lt.s32.totalorder %s1121_s13, %s1121_s13 }
   0x7   :  { %p1128_p3 = por %p1127_p2, %p1126_p1 }
   0x9   :  { %p1129_p4 = pnand %p1128_p3, %p1122_p0 }
   0xb   :  { %1132 = shalt.err (!%p1129_p4)
}
   0xc   :  { %19 = dma.hbm_to_vmem [thread:$0]  %s1255_s0, 32, %s17_s10, [#allocation5]  }
   0xd   :  { %s1141_s16 = scalar_lea.vmem %s26_s12, 256  ;;  %p1146_p6 = scmp.lt.s32.totalorder %s26_s12, %s26_s12 }
   0xe   :  { %p1142_p5 = scmp.ne.s32.totalorder %s26_s12, %s1141_s16  ;;  %p1147_p7 = scmp.lt.s32.totalorder %s1141_s16, %s1141_s16 }
  0x10   :  { %p1148_p8 = por %p1147_p7, %p1146_p6 }
  0x12   :  { %p1149_p9 = pnand %p1148_p8, %p1142_p5 }
  0x14   :  { %1152 = shalt.err (!%p1149_p9)
}
  0x15   :  { %s1181_s17 = smov 128   ;;  %s1182_s18 = smov 8  }
  0x16   :  { %31 = dma.hbm_to_vmem [thread:$0]  %s1256_s1, 256, %s26_s12, [#allocation8], %s1181_s17, %s1181_s17, %s1182_s18  }
  0x17   :  { %1173 = dma.done.wait [#allocation5], 32  }
  0x18   :  { %1174 = vsyncadd [#allocation5], 4294967264 }
  0x19   :  { %1175 = dma.done.wait [#allocation8], 256  }
  0x1a   :  { %1176 = vsyncadd [#allocation8], 4294967040  ;;  %v54_v0 = vlaneseq  ;;  %v1183_v1 = vmov 1966171168   ;;  %vm44_vm0 = vcmask 1024   ;;  %v1184_v4 = vmov 0.0  }
  0x1b   :  { %v52_v2 = vunpack.c.l.s4 %v1183_v1  ;;  %1041 = vmatprep.subr.mxu0 %v1184_v4  ;;  %vm1185_vm1 = vmmov 0   ;;  %45 = vst.msk [vmem:[#allocation3] sm:$0x3] %vm44_vm0, %v1184_v4  ;;  %1046 = vmatprep.subr.mxu1 %v1184_v4  ;;  %vm980_vm2 = vcmask 58368   ;;  %v46_v7 = vld [vmem:[#allocation4] sm:$0x3] }
  0x1c   :  { %v55_v3 = vshrl.u32 %v54_v0, 7  ;;  %1043 = vmatprep.mubr.msk.f32.mxu0 %vm1185_vm1, %v1184_v4  ;;  %1048 = vmatprep.mubr.msk.f32.mxu1 %vm1185_vm1, %v1184_v4  ;;  %v47_v8 = vld [vmem:[#allocation7] sm:$0xff]  ;;  %v48_v9 = vld [vmem:[#allocation7 + $0x8] sm:$0xff]  ;;  %v981_v10 = vsel %vm980_vm2, %v46_v7, 0.0  ;;  %vm73_vm3 = vcmask 64512   ;;  %v1186_v33 = vmov 0  }
  0x1d   :  { %v53_v5 = vunpack.c.0.s8 %v52_v2  ;;  %v107_v12 = vand.u32 4294901760, %v47_v8  ;;  %982 = vadd.xlane.f32.xlu0 %v981_v10  ;;  %v555_v13 = vand.u32 4294901760, %v48_v9  ;;  %vm42_vm4 = vcmask 254976   ;;  %s1187_s0 = smov [#allocation9]  }
  0x1e   :  { %1110 = vset.pattern.permute.xlu0 %v1186_v33  ;;  %43 = vst.msk [vmem:[#allocation2] sm:$0x3] %vm42_vm4, %v1184_v4  ;;  %vm973_vm5 = vcmask 1041409   ;;  %s1007_s1 = sshll.u32 %s1187_s0, 4  ;;  %s1008_s1 = int_to_ptr.vmem [resolvable:$true] %s1007_s1 }
  0x1f   :  { %v56_v6 = vsub.s32 %v53_v5, %v55_v3  ;;  %1042 = vmatpush3.msra.mxu0 %v107_v12  ;;  %v184_v16 = vsub.f32 %v47_v8, %v107_v12  ;;  %v632_v21 = vsub.f32 %v48_v9, %v555_v13  ;;  %s1153_s21 = scalar_lea.vmem %s1008_s1, 32  ;;  %p1158_p11 = scmp.lt.s32.totalorder %s1008_s1, %s1008_s1 }
  0x20   :  { %1051 = vmatprep.subr.mxu0 %v1184_v4  ;;  %p1154_p10 = scmp.ne.s32.totalorder %s1008_s1, %s1153_s21  ;;  %p1159_p12 = scmp.lt.s32.totalorder %s1153_s21, %s1153_s21 }
  0x21   :  { %v57_v11 = vrot.slane %v46_v7, %v56_v6  ;;  %v185_v19 = vand.u32 4294901760, %v184_v16  ;;  %v633_v28 = vand.u32 4294901760, %v632_v21 }
  0x22   :  { %v979_v38 = vld [vmem:[#allocation3] sm:$0x3]  ;;  %p1160_p13 = por %p1159_p12, %p1158_p11 }
  0x23   :  { %v58_v14 = vcombine.high %v57_v11, %v57_v11  ;;  %v65_v15 = vrot.slane %v57_v11, %v56_v6  ;;  %v186_v23 = vsub.f32 %v184_v16, %v185_v19  ;;  %v634_v32 = vsub.f32 %v632_v21, %v633_v28 }
  0x24   :  { %p1161_p0 = pnand %p1160_p13, %p1154_p10 }
  0x25   :  { %v72_v17 = vrot.slane %v58_v14, %v56_v6  ;;  %v74_v18 = vsel %vm73_vm3, %v65_v15, 0  ;;  %v187_v26 = vand.u32 4294901760, %v186_v23  ;;  %v635_v35 = vand.u32 4294901760, %v634_v32  ;;  %v49_v14 = vld [vmem:[#allocation2] sm:$0x3] }
  0x26   :  { %v142_v20 = vand.u32 4294901760, %v74_v18 }
  0x27   :  { %v522_v22 = vsel %vm73_vm3, %v72_v17, 0  ;;  %1047 = vmatpush3.msra.mxu1 %v187_v26 }
  0x28   :  { %v143_v24 = vsub.f32 %v74_v18, %v142_v20  ;;  %v590_v25 = vand.u32 4294901760, %v522_v22  ;;  %1049 = vmatmul.mubr.f32.vlgmr.msra.gmra.mxu1 %v142_v20  ;;  %1056 = vmatprep.subr.mxu1 %v1184_v4 }
  0x29   :  { %1057 = vmatpush3.msra.mxu1 %v107_v12  ;;  %1058 = vmatprep.mubr.msk.f32.mxu1 %vm1185_vm1, %v1184_v4 }
  0x2a   :  { %v144_v27 = vand.u32 4294901760, %v143_v24  ;;  %v591_v29 = vsub.f32 %v522_v22, %v590_v25  ;;  %1066 = vmatprep.subr.mxu1 %v1184_v4 }
  0x2c   :  { %v145_v30 = vsub.f32 %v143_v24, %v144_v27  ;;  %1059 = vmatmul.mubr.f32.vlgmr.msra.gmra.mxu1 %v144_v27  ;;  %v592_v34 = vand.u32 4294901760, %v591_v29 }
  0x2d   :  { %1067 = vmatpush3.msra.mxu1 %v107_v12  ;;  %1068 = vmatprep.mubr.msk.f32.mxu1 %vm1185_vm1, %v1184_v4 }
  0x2e   :  { %v146_v31 = vand.u32 4294901760, %v145_v30  ;;  %1076 = vmatprep.subr.mxu1 %v1184_v4  ;;  %v593_v36 = vsub.f32 %v591_v29, %v592_v34 }
  0x30   :  { %1044 = vmatmul.mubr.f32.vlgmr.msra.gmra.mxu0 %v146_v31  ;;  %1069 = vmatmul.mubr.f32.vlgmr.msra.gmra.mxu1 %v142_v20  ;;  %v594_v37 = vand.u32 4294901760, %v593_v36 }
  0x31   :  { %1052 = vmatpush3.msra.mxu0 %v184_v16  ;;  %1053 = vmatprep.mubr.msk.f32.mxu0 %vm1185_vm1, %v1184_v4 }
  0x32   :  { %1061 = vmatprep.subr.mxu0 %v1184_v4  ;;  %1077 = vmatpush3.msra.mxu1 %v635_v35 }
  0x33   :  { %1078 = vmatprep.mubr.msk.f32.mxu1 %vm1185_vm1, %v1184_v4  ;;  %1086 = vmatprep.subr.mxu1 %v1184_v4 }
  0x34   :  { %1054 = vmatmul.mubr.f32.vlgmr.msra.gmra.mxu0 %v143_v24  ;;  %1079 = vmatmul.mubr.f32.vlgmr.msra.gmra.mxu1 %v590_v25 }
  0x35   :  { %1062 = vmatpush3.msra.mxu0 %v185_v19  ;;  %1063 = vmatprep.mubr.msk.f32.mxu0 %vm1185_vm1, %v1184_v4 }
  0x36   :  { %1071 = vmatprep.subr.mxu0 %v1184_v4  ;;  %1087 = vmatpush3.msra.mxu1 %v555_v13 }
  0x37   :  { %1088 = vmatprep.mubr.msk.f32.mxu1 %vm1185_vm1, %v1184_v4  ;;  %1096 = vmatprep.subr.mxu1 %v1184_v4 }
  0x38   :  { %1064 = vmatmul.mubr.f32.vlgmr.msra.gmra.mxu0 %v142_v20  ;;  %1089 = vmatmul.mubr.f32.vlgmr.msra.gmra.mxu1 %v592_v34 }
  0x39   :  { %1072 = vmatpush3.msra.mxu0 %v555_v13  ;;  %1073 = vmatprep.mubr.msk.f32.mxu0 %vm1185_vm1, %v1184_v4 }
  0x3a   :  { %1081 = vmatprep.subr.mxu0 %v1184_v4  ;;  %1097 = vmatpush3.msra.mxu1 %v555_v13 }
  0x3b   :  { %1098 = vmatprep.mubr.msk.f32.mxu1 %vm1185_vm1, %v1184_v4 }
  0x3c   :  { %1074 = vmatmul.mubr.f32.vlgmr.msra.gmra.mxu0 %v594_v37  ;;  %1099 = vmatmul.mubr.f32.vlgmr.msra.gmra.mxu1 %v590_v25 }
  0x3d   :  { %1082 = vmatpush3.msra.mxu0 %v632_v21  ;;  %1083 = vmatprep.mubr.msk.f32.mxu0 %vm1185_vm1, %v1184_v4 }
  0x3e   :  { %1091 = vmatprep.subr.mxu0 %v1184_v4 }
  0x40   :  { %1084 = vmatmul.mubr.f32.vlgmr.msra.gmra.mxu0 %v591_v29 }
  0x41   :  { %1092 = vmatpush3.msra.mxu0 %v633_v28  ;;  %1093 = vmatprep.mubr.msk.f32.mxu0 %vm1185_vm1, %v1184_v4 }
  0x44   :  { %1094 = vmatmul.mubr.f32.vlgmr.msra.gmra.mxu0 %v590_v25 }
  0xa6   :  { %v983_v39 = vpop.xlane.xlu0 %982 }
  0xa7   :  { %v984_v40 = vadd.f32 %v983_v39, %v979_v38 }
  0xa9   :  { %986 = vst.msk [vmem:[#allocation3] sm:$0x3] %vm44_vm0, %v984_v40 }
  0xb0   :  { %v990_v41 = vld [vmem:[#allocation3] sm:$0x3] }
  0xb1   :  { %v991_v42 = vmax.f32 %v990_v41, 1e-08 }
  0xb3   :  { %995 = vperm.xlu0 %1110, %v991_v42  }
  0xe8   :  { %v224_v43 = vpop.f32.mrf.mxu1 }
  0xea   :  { %v1050_v44 = vpop.f32.mrf.mxu1 }
  0xec   :  { %v372_v46 = vpop.f32.mrf.mxu1 }
  0xee   :  { %v1060_v48 = vpop.f32.mrf.mxu1 }
  0xf0   :  { %v148_v45 = vpop.f32.mrf.mxu0  ;;  %v518_v50 = vpop.f32.mrf.mxu1 }
  0xf1   :  { %v225_v53 = vadd.f32 %v224_v43, %v148_v45 }
  0xf2   :  { %v1045_v47 = vpop.f32.mrf.mxu0  ;;  %v1070_v52 = vpop.f32.mrf.mxu1 }
  0xf4   :  { %v298_v49 = vpop.f32.mrf.mxu0  ;;  %v672_v55 = vpop.f32.mrf.mxu1 }
  0xf5   :  { %v299_v58 = vadd.f32 %v298_v49, %v225_v53 }
  0xf6   :  { %v1055_v51 = vpop.f32.mrf.mxu0  ;;  %v1080_v57 = vpop.f32.mrf.mxu1 }
  0xf7   :  { %v373_v0 = vadd.f32 %v372_v46, %v299_v58 }
  0xf8   :  { %v446_v54 = vpop.f32.mrf.mxu0  ;;  %v820_v60 = vpop.f32.mrf.mxu1 }
  0xf9   :  { %v447_v6 = vadd.f32 %v446_v54, %v373_v0 }
  0xfa   :  { %v1065_v56 = vpop.f32.mrf.mxu0  ;;  %v1090_v63 = vpop.f32.mrf.mxu1 }
  0xfb   :  { %v519_v11 = vadd.f32 %v518_v50, %v447_v6 }
  0xfc   :  { %v596_v59 = vpop.f32.mrf.mxu0  ;;  %v966_v2 = vpop.f32.mrf.mxu1 }
  0xfd   :  { %v673_v61 = vadd.f32 %v672_v55, %v596_v59 }
  0xfe   :  { %v1075_v62 = vpop.f32.mrf.mxu0  ;;  %v1100_v5 = vpop.f32.mrf.mxu1 }
 0x100   :  { %v746_v1 = vpop.f32.mrf.mxu0 }
 0x101   :  { %v747_v3 = vadd.f32 %v746_v1, %v673_v61 }
 0x102   :  { %v1085_v4 = vpop.f32.mrf.mxu0 }
 0x103   :  { %v821_v7 = vadd.f32 %v820_v60, %v747_v3 }
 0x104   :  { %v894_v8 = vpop.f32.mrf.mxu0 }
 0x105   :  { %v895_v9 = vadd.f32 %v894_v8, %v821_v7 }
 0x106   :  { %v1095_v10 = vpop.f32.mrf.mxu0 }
 0x107   :  { %v967_v12 = vadd.f32 %v966_v2, %v895_v9 }
 0x109   :  { %v972_v13 = vrot.slane %v967_v12, 7 }
 0x10b   :  { %v974_v15 = vsel %vm973_vm5, %v972_v13, %v519_v11 }
 0x10c   :  { %v976_v16 = vadd.f32 %v974_v15, %v49_v14 }
 0x10e   :  { %978 = vst.msk [vmem:[#allocation2] sm:$0x3] %vm42_vm4, %v976_v16 }
 0x115   :  { %v992_v19 = vld [vmem:[#allocation2] sm:$0x3] }
 0x12e   :  { %v996_v17 = vpop.permute.xlu0 %995 }
 0x12f   :  { %1111 = vrcp.f32 %v996_v17 }
 0x13c   :  { %v1112_v18 = vpop.eup %1111 }
 0x13d   :  { %v999_v20 = vmul.f32 %v1112_v18, %v992_v19 }
 0x13f   :  { %1000 = vst.msk [vmem:[#allocation9] sm:$0x3] %vm42_vm4, %v999_v20 }
 0x140   :  { %1164 = shalt.err (!%p1161_p0)
}
 0x141   :  { %1010 = dma.vmem_to_hbm [thread:$0]  %s1008_s1, 32, %s1257_s2, [#allocation6]  }
 0x142   :  { %1177 = dma.done.wait [#allocation6], 32  }
 0x143   :  { %1178 = vsyncadd [#allocation6], 4294967264 }
 0x144   :  { %1014 = vsyncpa [#allocation5], 1 }
 0x145   :  { %1015 = vsyncpa [#allocation8], 1 }
 0x146   :  { %1016 = vsyncpa [#allocation6], 1 }

</bundles_post_ra>
